<compile_context>
chip_gen: v6e
topology: v6e:2x2x1
jax: 0.10.0
libtpu: 0.0.40
codegen_flags: <defaults>
</compile_context>

<pallas_src>
import jax
import jax.numpy as jnp
from jax.experimental import pallas as pl
from jax.experimental.pallas import tpu as pltpu

EPS = 1e-5

_MAX_TILE_ROWS = 8192                 # per-step row cap
_MIN_STEP_BYTES = 2 * 1024 * 1024     # don't split below ~2 MiB wire data/step
_F32_TEMP_COPIES = 3                  # f32 upcast + centered/scaled temps per elem
_FALLBACK_VMEM_CAP = 64 * 1024 * 1024 # v7x per-TC size: safe everywhere


def _ln_compute(x_ref, w_ref, b_ref, o_ref):
    # x_ref: (tm, H) block in VMEM; w_ref / b_ref: (1, H) params (same block
    # every grid step, so they are not re-DMAed).
    x = x_ref[...].astype(jnp.float32)
    inv_h = jnp.float32(1.0 / x.shape[-1])           # constant mul, not divide
    # Single pass over the tile: both cross-lane reductions issue together.
    s1 = jnp.sum(x, axis=-1, keepdims=True)
    s2 = jnp.sum(x * x, axis=-1, keepdims=True)
    mean = s1 * inv_h
    var = jnp.maximum(s2 * inv_h - mean * mean, 0.0)  # clamp tiny negatives
    y = (x - mean) * jax.lax.rsqrt(var + EPS)
    y = y * w_ref[...].astype(jnp.float32)
    if b_ref is not None:
        y = y + b_ref[...].astype(jnp.float32)
    o_ref[...] = y.astype(o_ref.dtype)


def _ln_kernel_bias(x_ref, w_ref, b_ref, o_ref):
    _ln_compute(x_ref, w_ref, b_ref, o_ref)


def _ln_kernel_nobias(x_ref, w_ref, o_ref):
    _ln_compute(x_ref, w_ref, None, o_ref)


def _vmem_budgets():
    """Chip-aware (tile_budget_bytes, vmem_limit_bytes)."""
    try:
        cap = int(pltpu.get_tpu_info().vmem_capacity_bytes)
    except Exception:
        cap = _FALLBACK_VMEM_CAP
    # ~75% of physical VMEM, capped at 64 MiB:
    #   v5e/v6e (128 MiB) -> 64 MiB limit; v7x (64 MiB/TC) -> 48 MiB limit.
    limit = min((cap * 3) // 4, 64 * 1024 * 1024)
    limit = max(limit, 32 * 1024 * 1024)
    # Leave headroom for params, semaphores and compiler scratch.
    budget = int(limit * 0.85)
    return budget, limit


def _pick_tile_rows(rows, hidden, itemsize, tile_budget):
    """Largest row tile (multiple of 8) that fits the VMEM tile budget,
    split so v7x's two TensorCores each get >= 2 pipelined steps when rows
    allow, without shrinking a step below ~2 MiB of wire data."""
    if rows <= 8:
        # Single block equal to the full row extent (satisfies the (8,128)
        # rule via the "equals full array dim" clause).
        return rows

    # Per-row VMEM: 2x double-buffered input + output at wire dtype, plus the
    # in-kernel f32 working set (upcast + temps).
    bytes_per_row = 4 * hidden * itemsize + _F32_TEMP_COPIES * hidden * 4
    tm = tile_budget // max(bytes_per_row, 1)
    tm = min(tm, _MAX_TILE_ROWS)

    # Prefer >= 4 total grid steps (>= 2 per v7x TensorCore) so each core
    # double-buffers, but keep each step >= ~2 MiB of wire data so the fixed
    # per-step overhead stays amortized.
    quarter = rows // 4
    min_rows = _MIN_STEP_BYTES // max(hidden * itemsize, 1)
    target = max(quarter, min_rows)

    tm = min(tm, target, rows)
    tm = max((tm // 8) * 8, 8)
    return tm


def layer_norm(x, weight, bias=None):
    """Pallas LayerNorm over the last axis of `x` (torch F.layer_norm, eps=1e-5).

    x:      (..., H)
    weight: (H,)
    bias:   (H,) or None (None == bias=False in the PyTorch module)
    """
    H = x.shape[-1]
    assert weight.shape == (H,)
    orig_shape = x.shape

    # Empty input: nothing to normalize.
    if any(int(d) == 0 for d in orig_shape):
        return x

    rows = 1
    for d in orig_shape[:-1]:
        rows *= int(d)
    rows = max(rows, 1)

    x2 = x.reshape(rows, H)
    w2 = weight.reshape(1, H)

    tile_budget, vmem_limit = _vmem_budgets()
    tm = _pick_tile_rows(rows, H, jnp.dtype(x.dtype).itemsize, tile_budget)
    grid = (pl.cdiv(rows, tm),)

    x_spec = pl.BlockSpec((tm, H), lambda i: (i, 0))
    p_spec = pl.BlockSpec((1, H), lambda i: (0, 0))
    o_spec = pl.BlockSpec((tm, H), lambda i: (i, 0))

    compiler_params = pltpu.CompilerParams(
        dimension_semantics=("parallel",),
        vmem_limit_bytes=vmem_limit,
    )

    if bias is None:
        out = pl.pallas_call(
            _ln_kernel_nobias,
            out_shape=jax.ShapeDtypeStruct((rows, H), x.dtype),
            grid_spec=pltpu.PrefetchScalarGridSpec(
                num_scalar_prefetch=0,
                grid=grid,
                in_specs=[x_spec, p_spec],
                out_specs=o_spec,
            ),
            compiler_params=compiler_params,
        )(x2, w2)
    else:
        b2 = bias.reshape(1, H)
        out = pl.pallas_call(
            _ln_kernel_bias,
            out_shape=jax.ShapeDtypeStruct((rows, H), x.dtype),
            grid_spec=pltpu.PrefetchScalarGridSpec(
                num_scalar_prefetch=0,
                grid=grid,
                in_specs=[x_spec, p_spec, p_spec],
                out_specs=o_spec,
            ),
            compiler_params=compiler_params,
        )(x2, w2, b2)

    # TODO(synk): for genuinely narrow H (< 128, like this demo's H=32) output
    # stores are lane-masked (vst.msk); a row-packing layout (128/H rows per
    # lane group with segmented reductions) would recover lane-dense stores,
    # but transformer hidden sizes (multiples of 128) already hit the
    # lane-dense fast path.
    return out.reshape(orig_shape)


def _reference_layer_norm(x, weight, bias):
    xf = x.astype(jnp.float32)
    mean = jnp.mean(xf, axis=-1, keepdims=True)
    var = jnp.mean((xf - mean) ** 2, axis=-1, keepdims=True)
    y = (xf - mean) * jax.lax.rsqrt(var + EPS)
    y = y * weight
    if bias is not None:
        y = y + bias
    return y.astype(x.dtype)


if __name__ == "__main__":
    key = jax.random.PRNGKey(0)
    batch, seq, hidden = 2, 8, 32

    # Deterministic parameter init matching nn.Parameter(torch.ones / zeros).
    weight = jnp.ones((hidden,), dtype=jnp.float32)
    bias = jnp.zeros((hidden,), dtype=jnp.float32)   # module with bias=True

    x = jax.random.normal(key, (batch, seq, hidden), dtype=jnp.float32)

    # bias=True path
    out = jax.block_until_ready(layer_norm(x, weight, bias))
    ref = _reference_layer_norm(x, weight, bias)
    assert out.shape == x.shape
    assert jnp.allclose(out, ref, atol=1e-5, rtol=1e-5)

    # bias=False path (bias=None) like the PyTorch module with bias=False.
    out_nb = jax.block_until_ready(layer_norm(x, weight, None))
    ref_nb = _reference_layer_norm(x, weight, None)
    assert jnp.allclose(out_nb, ref_nb, atol=1e-5, rtol=1e-5)

    # Exercise a non-multiple-of-8 / non-divisible row count to cover the
    # pl.cdiv boundary-block path.
    x_odd = jax.random.normal(jax.random.PRNGKey(1), (3, 7, hidden), jnp.float32)
    out_odd = jax.block_until_ready(layer_norm(x_odd, weight, bias))
    ref_odd = _reference_layer_norm(x_odd, weight, bias)
    assert jnp.allclose(out_odd, ref_odd, atol=1e-5, rtol=1e-5)

    print("KERNEL_OK")
</pallas_src>

<mosaic_0001>
module attributes {stable_mosaic.version = 11 : i64} {
  func.func @_ln_kernel_bias(%arg0: i32, %arg1: memref<16x32xf32, #tpu.memory_space<vmem>>, %arg2: memref<1x32xf32, #tpu.memory_space<vmem>>, %arg3: memref<1x32xf32, #tpu.memory_space<vmem>>, %arg4: memref<16x32xf32, #tpu.memory_space<vmem>>) attributes {dimension_semantics = [#tpu.dimension_semantics<parallel>], iteration_bounds = array<i64: 1>, scalar_prefetch = 0 : i64, scratch_operands = 0 : i64, tpu.core_type = #tpu.core_type<tc>, window_params = [{transform_indices = @transform_0, window_bounds = array<i64: 16, 32>}, {pipeline_mode = #tpu.pipeline_mode<synchronous>, transform_indices = @transform_1, window_bounds = array<i64: 1, 32>}, {pipeline_mode = #tpu.pipeline_mode<synchronous>, transform_indices = @transform_2, window_bounds = array<i64: 1, 32>}, {transform_indices = @transform_3, window_bounds = array<i64: 16, 32>}]} {
    %c0 = arith.constant 0 : index
    %c0_0 = arith.constant 0 : index
    %0 = vector.load %arg1[%c0, %c0_0] : memref<16x32xf32, #tpu.memory_space<vmem>>, vector<16x32xf32>
    %cst = arith.constant dense<0.000000e+00> : vector<16xf32>
    %1 = vector.multi_reduction <add>, %0, %cst [1] : vector<16x32xf32> to vector<16xf32>
    %2 = vector.shape_cast %1 : vector<16xf32> to vector<16x1xf32>
    %3 = arith.mulf %0, %0 : vector<16x32xf32>
    %cst_1 = arith.constant dense<0.000000e+00> : vector<16xf32>
    %4 = vector.multi_reduction <add>, %3, %cst_1 [1] : vector<16x32xf32> to vector<16xf32>
    %5 = vector.shape_cast %4 : vector<16xf32> to vector<16x1xf32>
    %cst_2 = arith.constant 3.125000e-02 : f32
    %6 = vector.broadcast %cst_2 : f32 to vector<16x1xf32>
    %7 = arith.mulf %2, %6 : vector<16x1xf32>
    %cst_3 = arith.constant 3.125000e-02 : f32
    %8 = vector.broadcast %cst_3 : f32 to vector<16x1xf32>
    %9 = arith.mulf %5, %8 : vector<16x1xf32>
    %10 = arith.mulf %7, %7 : vector<16x1xf32>
    %11 = arith.subf %9, %10 : vector<16x1xf32>
    %cst_4 = arith.constant 0.000000e+00 : f32
    %12 = vector.broadcast %cst_4 : f32 to vector<16x1xf32>
    %13 = arith.maximumf %11, %12 : vector<16x1xf32>
    %14 = vector.broadcast %7 : vector<16x1xf32> to vector<16x32xf32>
    %15 = arith.subf %0, %14 : vector<16x32xf32>
    %cst_5 = arith.constant 9.99999974E-6 : f32
    %16 = vector.broadcast %cst_5 : f32 to vector<16x1xf32>
    %17 = arith.addf %13, %16 : vector<16x1xf32>
    %18 = math.rsqrt %17 : vector<16x1xf32>
    %19 = vector.broadcast %18 : vector<16x1xf32> to vector<16x32xf32>
    %20 = arith.mulf %15, %19 : vector<16x32xf32>
    %c0_6 = arith.constant 0 : index
    %c0_7 = arith.constant 0 : index
    %21 = vector.load %arg2[%c0_6, %c0_7] : memref<1x32xf32, #tpu.memory_space<vmem>>, vector<1x32xf32>
    %22 = vector.broadcast %21 : vector<1x32xf32> to vector<16x32xf32>
    %23 = arith.mulf %20, %22 : vector<16x32xf32>
    %c0_8 = arith.constant 0 : index
    %c0_9 = arith.constant 0 : index
    %24 = vector.load %arg3[%c0_8, %c0_9] : memref<1x32xf32, #tpu.memory_space<vmem>>, vector<1x32xf32>
    %25 = vector.broadcast %24 : vector<1x32xf32> to vector<16x32xf32>
    %26 = arith.addf %23, %25 : vector<16x32xf32>
    %c0_10 = arith.constant 0 : index
    %c0_11 = arith.constant 0 : index
    %27 = vector.load %arg4[%c0_10, %c0_11] : memref<16x32xf32, #tpu.memory_space<vmem>>, vector<16x32xf32>
    tpu.vector_store %arg4[%c0_10, %c0_11], %26 {strides = array<i32>} : memref<16x32xf32, #tpu.memory_space<vmem>>, vector<16x32xf32>,
    return
  }
  func.func @transform_0(%arg0: i32) -> (i32, i32) {
    %c0_i32 = arith.constant 0 : i32
    %c0_i32_0 = arith.constant 0 : i32
    return %arg0, %c0_i32 : i32, i32
  }
  func.func @transform_1(%arg0: i32) -> (i32, i32) {
    %c0_i32 = arith.constant 0 : i32
    %c0_i32_0 = arith.constant 0 : i32
    %c0_i32_1 = arith.constant 0 : i32
    return %c0_i32, %c0_i32_0 : i32, i32
  }
  func.func @transform_2(%arg0: i32) -> (i32, i32) {
    %c0_i32 = arith.constant 0 : i32
    %c0_i32_0 = arith.constant 0 : i32
    %c0_i32_1 = arith.constant 0 : i32
    return %c0_i32, %c0_i32_0 : i32, i32
  }
  func.func @transform_3(%arg0: i32) -> (i32, i32) {
    %c0_i32 = arith.constant 0 : i32
    %c0_i32_0 = arith.constant 0 : i32
    return %arg0, %c0_i32 : i32, i32
  }
}

</mosaic_0001>

<bundles_post_ra>
// kernel: tpu_custom_call.1
= control target key start
LH: loop header
LB: loop body
LE: loop exit
PB: predicated region body
PF: predicated region fallthrough
CT: control target
= control target key end

     0   :  { %8 = vsyncpa [#allocation3], 0  ;;  %s203_s0 = inlined_call_operand.hbm [shape: f32[16,32], index: 0, kind: input, shape index: {}]   ;;  %s204_s1 = inlined_call_operand.vmem [shape: f32[1,32], index: 1, kind: input, shape index: {}]   ;;  %s205_s2 = inlined_call_operand.vmem [shape: f32[1,32], index: 2, kind: input, shape index: {}]   ;;  %s206_s3 = inlined_call_operand.hbm [shape: f32[16,32], index: 3, kind: output, shape index: {}]  }
   0x1   :  { %9 = vsyncpa [#allocation4], 0  ;;  %s155_s12 = smov [#allocation2]  }
   0x2   :  { %s15_s13 = sshll.u32 %s155_s12, 4  ;;  %s16_s13 = int_to_ptr.vmem [resolvable:$true] %s15_s13 }
   0x3   :  { %s119_s14 = scalar_lea.vmem %s16_s13, 256  ;;  %p124_p1 = scmp.lt.s32.totalorder %s16_s13, %s16_s13 }
   0x4   :  { %p120_p0 = scmp.ne.s32.totalorder %s16_s13, %s119_s14  ;;  %p125_p2 = scmp.lt.s32.totalorder %s119_s14, %s119_s14 }
   0x6   :  { %p126_p3 = por %p125_p2, %p124_p1 }
   0x8   :  { %p127_p4 = pnand %p126_p3, %p120_p0 }
   0xa   :  { %130 = shalt.err (!%p127_p4)
}
   0xb   :  { %s156_s15 = smov 128   ;;  %s157_s16 = smov 8  }
   0xc   :  { %21 = dma.hbm_to_vmem [thread:$0]  %s203_s0, 256, %s16_s13, [#allocation3], %s156_s15, %s156_s15, %s157_s16  }
   0xd   :  { %151 = dma.done.wait [#allocation3], 256  }
   0xe   :  { %152 = vsyncadd [#allocation3], 4294967040  ;;  %vm31_vm0 = vcmask 261120   ;;  %v29_v0 = vld [vmem:[#allocation2] sm:$0xff]  ;;  %v30_v1 = vld [vmem:[#allocation2 + $0x8] sm:$0xff]  ;;  %s158_s22 = smov [#allocation5]  }
   0xf   :  { %v32_v2 = vsel %vm31_vm0, %v29_v0, 0.0  ;;  %v38_v3 = vmul.f32 %v29_v0, %v29_v0  ;;  %v39_v4 = vmul.f32 %v30_v1, %v30_v1  ;;  %v35_v6 = vsel %vm31_vm0, %v30_v1, 0.0  ;;  %v101_v26 = vld [vmem:[%s204_s1] ss:$0 sm:$0xff]  ;;  %s89_s23 = sshll.u32 %s158_s22, 4  ;;  %s90_s23 = int_to_ptr.vmem [resolvable:$true] %s89_s23 }
  0x10   :  { %33 = vadd.xlane.f32.xlu0 %v32_v2  ;;  %v102_v28 = vld [vmem:[%s205_s2] ss:$0 sm:$0xff]  ;;  %s131_s1 = scalar_lea.vmem %s90_s23, 256  ;;  %p136_p6 = scmp.lt.s32.totalorder %s90_s23, %s90_s23 }
  0x11   :  { %v40_v5 = vsel %vm31_vm0, %v38_v3, 0.0  ;;  %v43_v7 = vsel %vm31_vm0, %v39_v4, 0.0  ;;  %p132_p5 = scmp.ne.s32.totalorder %s90_s23, %s131_s1  ;;  %p137_p7 = scmp.lt.s32.totalorder %s131_s1, %s131_s1 }
  0x12   :  { %41 = vadd.xlane.f32.xlu1 %v40_v5 }
  0x13   :  { %p138_p8 = por %p137_p7, %p136_p6 }
  0x14   :  { %36 = vadd.xlane.f32.xlu0 %v35_v6 }
  0x15   :  { %p139_p9 = pnand %p138_p8, %p132_p5 }
  0x16   :  { %44 = vadd.xlane.f32.xlu1 %v43_v7 }
  0x99   :  { %v34_v8 = vpop.xlane.xlu0 %33 }
  0x9a   :  { %v46_v9 = vmul.f32 0.03125, %v34_v8 }
  0x9b   :  { %v42_v10 = vpop.xlane.xlu1 %41 }
  0x9c   :  { %v50_v11 = vmul.f32 %v46_v9, %v46_v9  ;;  %v48_v12 = vmul.f32 0.03125, %v42_v10  ;;  %v56_v24 = vsub.f32 %v29_v0, %v46_v9 }
  0x9d   :  { %v37_v13 = vpop.xlane.xlu0 %36 }
  0x9e   :  { %v52_v14 = vsub.f32 %v48_v12, %v50_v11  ;;  %v47_v15 = vmul.f32 0.03125, %v37_v13 }
  0x9f   :  { %v45_v16 = vpop.xlane.xlu1 %44 }
  0xa0   :  { %v54_v17 = vmax.f32 %v52_v14, 0.0  ;;  %v51_v18 = vmul.f32 %v47_v15, %v47_v15  ;;  %v49_v19 = vmul.f32 0.03125, %v45_v16  ;;  %v57_v29 = vsub.f32 %v30_v1, %v47_v15 }
  0xa2   :  { %v58_v20 = vadd.f32 1e-05, %v54_v17  ;;  %v53_v21 = vsub.f32 %v49_v19, %v51_v18 }
  0xa4   :  { %107 = vrsqrt.f32 %v58_v20  ;;  %v55_v22 = vmax.f32 %v53_v21, 0.0 }
  0xa6   :  { %v59_v23 = vadd.f32 1e-05, %v55_v22 }
  0xa8   :  { %109 = vrsqrt.f32 %v59_v23 }
  0xb1   :  { %v108_v25 = vpop.eup %107 }
  0xb2   :  { %v62_v27 = vmul.f32 %v108_v25, %v56_v24 }
  0xb4   :  { %v71_v30 = vmul.f32 %v101_v26, %v62_v27 }
  0xb5   :  { %v110_v31 = vpop.eup %109 }
  0xb6   :  { %v63_v32 = vmul.f32 %v110_v31, %v57_v29  ;;  %v80_v33 = vadd.f32 %v102_v28, %v71_v30 }
  0xb8   :  { %v72_v34 = vmul.f32 %v101_v26, %v63_v32  ;;  %82 = vst.msk [vmem:[#allocation5] sm:$0xff] %vm31_vm0, %v80_v33 }
  0xba   :  { %v81_v35 = vadd.f32 %v102_v28, %v72_v34 }
  0xbc   :  { %83 = vst.msk [vmem:[#allocation5 + $0x8] sm:$0xff] %vm31_vm0, %v81_v35 }
  0xbd   :  { %142 = shalt.err (!%p139_p9)
}
  0xbe   :  { %95 = dma.vmem_to_hbm [thread:$0]  %s90_s23, 256, %s206_s3, [#allocation4], %s156_s15, %s156_s15, %s157_s16  }
  0xbf   :  { %153 = dma.done.wait [#allocation4], 256  }
  0xc0   :  { %154 = vsyncadd [#allocation4], 4294967040 }
  0xc1   :  { %99 = vsyncpa [#allocation3], 1 }
  0xc2   :  { %100 = vsyncpa [#allocation4], 1 }

</bundles_post_ra>
